<compile_context>
chip_gen: v6e
topology: v6e:2x2x1
jax: 0.10.0
libtpu: 0.0.40
codegen_flags: <defaults>
</compile_context>

<pallas_src>
import functools
import math

import jax
import jax.numpy as jnp
from jax.experimental import pallas as pl
from jax.experimental.pallas import tpu as pltpu


# ---------------------------------------------------------------------------
# helpers
# ---------------------------------------------------------------------------

def _round_up(n, m):
    return ((n + m - 1) // m) * m


def _pad_2d(a, rows, cols):
    r, c = a.shape
    if r == rows and c == cols:
        return a
    return jnp.pad(a, ((0, rows - r), (0, cols - c)))


_VMEM_LIMIT = 48 * 1024 * 1024   # safe on v5e/v6e (128 MiB) and v7x (64 MiB)


# ---------------------------------------------------------------------------
# Tiled linear (+ bias + activation + optional fused gate)
# ---------------------------------------------------------------------------

def _linear_kernel(*refs, act, n_k, has_gate, gate_pos):
    if has_gate:
        x_ref, w_ref, b_ref, g_ref, o_ref, acc_ref = refs
    else:
        x_ref, w_ref, b_ref, o_ref, acc_ref = refs
        g_ref = None

    @pl.when(pl.program_id(2) == 0)
    def _():
        acc_ref[...] = jnp.zeros_like(acc_ref)

    xv = x_ref[...]
    if has_gate and gate_pos == "in":
        xv = xv * g_ref[...]
    acc_ref[...] += jnp.dot(xv, w_ref[...], preferred_element_type=jnp.float32)

    @pl.when(pl.program_id(2) == n_k - 1)
    def _():
        y = acc_ref[...] + b_ref[...]
        if act == "gelu_new":       # GPT-2 tanh approximation
            y = 0.5 * y * (1.0 + jnp.tanh(0.7978845608028654 * (y + 0.044715 * y * y * y)))
        elif act == "gelu":         # exact erf GELU (nn.GELU default)
            y = 0.5 * y * (1.0 + jax.lax.erf(y * 0.7071067811865476))
        elif act == "sigmoid":
            y = jax.nn.sigmoid(y)
        elif act == "relu_sq":      # RWKV channel-mix: square(relu(.))
            y = jnp.square(jnp.maximum(y, 0.0))
        if has_gate and gate_pos == "out":
            y = y * g_ref[...].astype(jnp.float32)
        o_ref[...] = y.astype(o_ref.dtype)


def pallas_linear(x, w, b=None, act="none", gate=None, gate_pos="out",
                  out_dtype=jnp.bfloat16):
    """y = act(x @ w + b) [* gate]   (gate_pos='in' multiplies x before the matmul)."""
    M, K = x.shape
    Kw, N = w.shape
    assert K == Kw
    x = x.astype(jnp.bfloat16)
    w = w.astype(jnp.bfloat16)
    if b is None:
        b = jnp.zeros((N,), jnp.float32)
    b = jnp.asarray(b, jnp.float32).reshape(1, N)

    # tile selection: big lane-dense tiles; small dims stay as full-dim blocks
    TM = 256 if M > 256 else _round_up(M, 8)
    TN = 512 if N > 512 else N
    TK = 512 if K > 512 else K
    Mp, Np, Kp = _round_up(M, TM), _round_up(N, TN), _round_up(K, TK)

    xp = _pad_2d(x, Mp, Kp)
    wp = _pad_2d(w, Kp, Np)
    bp = _pad_2d(b, 1, Np)

    gm, gn, gk = Mp // TM, Np // TN, Kp // TK

    in_specs = [
        pl.BlockSpec((TM, TK), lambda i, j, k: (i, k)),
        pl.BlockSpec((TK, TN), lambda i, j, k: (k, j)),
        pl.BlockSpec((1, TN), lambda i, j, k: (0, j)),
    ]
    inputs = [xp, wp, bp]
    if gate is not None:
        if gate_pos == "in":
            inputs.append(_pad_2d(gate.astype(jnp.bfloat16), Mp, Kp))
            in_specs.append(pl.BlockSpec((TM, TK), lambda i, j, k: (i, k)))
        else:
            inputs.append(_pad_2d(gate.astype(jnp.bfloat16), Mp, Np))
            in_specs.append(pl.BlockSpec((TM, TN), lambda i, j, k: (i, j)))

    out = pl.pallas_call(
        functools.partial(_linear_kernel, act=act, n_k=gk,
                          has_gate=(gate is not None), gate_pos=gate_pos),
        grid=(gm, gn, gk),
        in_specs=in_specs,
        out_specs=pl.BlockSpec((TM, TN), lambda i, j, k: (i, j)),
        out_shape=jax.ShapeDtypeStruct((Mp, Np), out_dtype),
        scratch_shapes=[pltpu.VMEM((TM, TN), jnp.float32)],
        compiler_params=pltpu.CompilerParams(
            dimension_semantics=("parallel", "parallel", "arbitrary"),
            vmem_limit_bytes=_VMEM_LIMIT),
    )(*inputs)
    if Mp != M or Np != N:
        out = out[:M, :N]
    return out


# ---------------------------------------------------------------------------
# LayerNorm (row-tiled)
# ---------------------------------------------------------------------------

def _ln_kernel(x_ref, g_ref, b_ref, o_ref, *, eps):
    x = x_ref[...].astype(jnp.float32)
    mu = jnp.mean(x, axis=-1, keepdims=True)
    xc = x - mu
    var = jnp.mean(xc * xc, axis=-1, keepdims=True)
    y = xc * jax.lax.rsqrt(var + eps) * g_ref[...] + b_ref[...]
    o_ref[...] = y.astype(o_ref.dtype)


def pallas_layernorm(x, g, b, eps=1e-5, out_dtype=None):
    shape = x.shape
    H = shape[-1]
    x2 = x.reshape(-1, H)
    M = x2.shape[0]
    TM = 256 if M > 256 else _round_up(M, 8)
    Mp = _round_up(M, TM)
    x2p = _pad_2d(x2, Mp, H)
    odt = out_dtype if out_dtype is not None else x.dtype
    out = pl.pallas_call(
        functools.partial(_ln_kernel, eps=eps),
        grid=(Mp // TM,),
        in_specs=[pl.BlockSpec((TM, H), lambda i: (i, 0)),
                  pl.BlockSpec((1, H), lambda i: (0, 0)),
                  pl.BlockSpec((1, H), lambda i: (0, 0))],
        out_specs=pl.BlockSpec((TM, H), lambda i: (i, 0)),
        out_shape=jax.ShapeDtypeStruct((Mp, H), odt),
        compiler_params=pltpu.CompilerParams(dimension_semantics=("parallel",)),
    )(x2p, jnp.asarray(g, jnp.float32).reshape(1, H),
      jnp.asarray(b, jnp.float32).reshape(1, H))
    return out[:M].reshape(shape)


# ---------------------------------------------------------------------------
# Flash-style causal attention
# ---------------------------------------------------------------------------

def _flash_attn_kernel(q_ref, k_ref, v_ref, o_ref, m_sc, l_sc, acc_sc,
                       *, scale, tq, tkv):
    qi = pl.program_id(1)
    ki = pl.program_id(2)

    @pl.when(ki == 0)
    def _():
        m_sc[...] = jnp.full_like(m_sc, -1e30)
        l_sc[...] = jnp.zeros_like(l_sc)
        acc_sc[...] = jnp.zeros_like(acc_sc)

    # skip kv tiles fully above the diagonal
    @pl.when(ki * tkv <= qi * tq + (tq - 1))
    def _():
        s = jnp.einsum("bqd,bkd->bqk", q_ref[...], k_ref[...],
                       preferred_element_type=jnp.float32) * scale
        row = qi * tq + jax.lax.broadcasted_iota(jnp.int32, s.shape, 1)
        col = ki * tkv + jax.lax.broadcasted_iota(jnp.int32, s.shape, 2)
        s = jnp.where(col <= row, s, -1e30)       # in-kernel causal mask
        m_prev = m_sc[...]
        m_new = jnp.maximum(m_prev, jnp.max(s, axis=-1, keepdims=True))
        alpha = jnp.exp(m_prev - m_new)
        p = jnp.exp(s - m_new)
        l_sc[...] = alpha * l_sc[...] + jnp.sum(p, axis=-1, keepdims=True)
        acc_sc[...] = alpha * acc_sc[...] + jnp.einsum(
            "bqk,bkd->bqd", p.astype(v_ref.dtype), v_ref[...],
            preferred_element_type=jnp.float32)
        m_sc[...] = m_new

    @pl.when(ki == pl.num_programs(2) - 1)
    def _():
        inv = pl.reciprocal(l_sc[...], approx=True)
        o_ref[...] = (acc_sc[...] * inv).astype(o_ref.dtype)


def pallas_attention(q, k, v, scale):
    # q, k, v : [batch*heads, seq, head_dim]
    BH, S, hd = q.shape
    TQ = 128 if S > 128 else _round_up(S, 8)
    Sp = _round_up(S, TQ)
    if Sp != S:
        pad = ((0, 0), (0, Sp - S), (0, 0))
        q, k, v = jnp.pad(q, pad), jnp.pad(k, pad), jnp.pad(v, pad)
    n_t = Sp // TQ
    out = pl.pallas_call(
        functools.partial(_flash_attn_kernel, scale=scale, tq=TQ, tkv=TQ),
        grid=(BH, n_t, n_t),
        in_specs=[pl.BlockSpec((1, TQ, hd), lambda b, qi, ki: (b, qi, 0)),
                  pl.BlockSpec((1, TQ, hd), lambda b, qi, ki: (b, ki, 0)),
                  pl.BlockSpec((1, TQ, hd), lambda b, qi, ki: (b, ki, 0))],
        out_specs=pl.BlockSpec((1, TQ, hd), lambda b, qi, ki: (b, qi, 0)),
        out_shape=jax.ShapeDtypeStruct((BH, Sp, hd), jnp.bfloat16),
        scratch_shapes=[pltpu.VMEM((1, TQ, 1), jnp.float32),
                        pltpu.VMEM((1, TQ, 1), jnp.float32),
                        pltpu.VMEM((1, TQ, hd), jnp.float32)],
        compiler_params=pltpu.CompilerParams(
            dimension_semantics=("parallel", "parallel", "arbitrary"),
            vmem_limit_bytes=_VMEM_LIMIT),
    )(q.astype(jnp.bfloat16), k.astype(jnp.bfloat16), v.astype(jnp.bfloat16))
    return out[:, :S, :]


# ---------------------------------------------------------------------------
# RWKV WKV recurrence (state carried in vregs, lane-dense channel fold)
# ---------------------------------------------------------------------------

def _wkv_kernel(k_ref, v_ref, w_ref, u_ref, o_ref):
    S = k_ref.shape[0]
    w = w_ref[...].astype(jnp.float32)   # (8, C)
    u = u_ref[...].astype(jnp.float32)

    def body(t, carry):
        aa, bb, pp = carry
        kt = k_ref[t].astype(jnp.float32)
        vt = v_ref[t].astype(jnp.float32)
        ww = u + kt
        qq = jnp.maximum(pp, ww)
        e1 = jnp.exp(pp - qq)
        e2 = jnp.exp(ww - qq)
        num = e1 * aa + e2 * vt
        den = e1 * bb + e2                         # always >= 1
        o_ref[t] = (num * pl.reciprocal(den, approx=True)).astype(o_ref.dtype)
        ww2 = pp + w
        qq2 = jnp.maximum(ww2, kt)
        e1b = jnp.exp(ww2 - qq2)
        e2b = jnp.exp(kt - qq2)
        return (e1b * aa + e2b * vt, e1b * bb + e2b, qq2)

    zeros = jnp.zeros(w.shape, jnp.float32)
    init = (zeros, zeros, jnp.full(w.shape, -1e30, jnp.float32))
    jax.lax.fori_loop(0, S, body, init, unroll=2)


def pallas_wkv(k, v, w, u):
    # k, v : [batch, seq, hidden]  ->  recurrence over seq, channels folded (8, C) lane-dense
    B, S, H = k.shape
    BH = B * H
    k2 = jnp.transpose(k, (1, 0, 2)).reshape(S, BH).astype(jnp.bfloat16)
    v2 = jnp.transpose(v, (1, 0, 2)).reshape(S, BH).astype(jnp.bfloat16)
    w2 = jnp.tile(jnp.asarray(w, jnp.float32).reshape(1, H), (B, 1)).reshape(1, BH)
    u2 = jnp.tile(jnp.asarray(u, jnp.float32).reshape(1, H), (B, 1)).reshape(1, BH)

    C = _round_up(BH, 8) // 8
    if C > 128:
        C = _round_up(C, 128)
        TC = 128
    else:
        TC = C
    BHp = 8 * C

    k3 = _pad_2d(k2, S, BHp).reshape(S, 8, C)
    v3 = _pad_2d(v2, S, BHp).reshape(S, 8, C)
    w3 = _pad_2d(w2, 1, BHp).reshape(8, C)
    u3 = _pad_2d(u2, 1, BHp).reshape(8, C)

    out = pl.pallas_call(
        _wkv_kernel,
        grid=(C // TC,),
        in_specs=[pl.BlockSpec((S, 8, TC), lambda c: (0, 0, c)),
                  pl.BlockSpec((S, 8, TC), lambda c: (0, 0, c)),
                  pl.BlockSpec((8, TC), lambda c: (0, c)),
                  pl.BlockSpec((8, TC), lambda c: (0, c))],
        out_specs=pl.BlockSpec((S, 8, TC), lambda c: (0, 0, c)),
        out_shape=jax.ShapeDtypeStruct((S, 8, C), jnp.bfloat16),
        compiler_params=pltpu.CompilerParams(dimension_semantics=("parallel",)),
    )(k3, v3, w3, u3)
    out = out.reshape(S, BHp)[:, :BH].reshape(S, B, H)
    return jnp.transpose(out, (1, 0, 2))


# ---------------------------------------------------------------------------
# Model blocks (glue around kernels)
# ---------------------------------------------------------------------------

def rwkv_block(x, state, p):
    # TODO(synk): RWKVBlock source was not provided; standard RWKV-v4 style
    # time-mix + channel-mix is implemented, with state = (att_shift, ffn_shift).
    B, S, H = x.shape
    last_att, last_ffn = state
    flat = lambda t: t.reshape(B * S, H)

    xa = pallas_layernorm(x, p["ln1_g"], p["ln1_b"])
    x_prev = jnp.concatenate([last_att[:, None, :], xa[:, :-1, :]], axis=1)
    mk, mv, mr = p["att_mix_k"], p["att_mix_v"], p["att_mix_r"]
    xk = xa * mk + x_prev * (1.0 - mk)
    xv = xa * mv + x_prev * (1.0 - mv)
    xr = xa * mr + x_prev * (1.0 - mr)
    r = pallas_linear(flat(xr), p["att_wr"], act="sigmoid")           # [BS, H]
    k = pallas_linear(flat(xk), p["att_wk"]).reshape(B, S, H)
    v = pallas_linear(flat(xv), p["att_wv"]).reshape(B, S, H)
    w_decay = -jnp.exp(p["time_decay"])
    wkv = pallas_wkv(k, v, w_decay, p["time_first"])                  # [B, S, H]
    # fused: (r * wkv) @ att_wo
    att_out = pallas_linear(flat(wkv), p["att_wo"], gate=r, gate_pos="in").reshape(B, S, H)
    x = x + att_out

    xf = pallas_layernorm(x, p["ln2_g"], p["ln2_b"])
    xf_prev = jnp.concatenate([last_ffn[:, None, :], xf[:, :-1, :]], axis=1)
    fk, fr = p["ffn_mix_k"], p["ffn_mix_r"]
    xk2 = xf * fk + xf_prev * (1.0 - fk)
    xr2 = xf * fr + xf_prev * (1.0 - fr)
    kk = pallas_linear(flat(xk2), p["ffn_wk"], act="relu_sq")         # [BS, 4H]
    rr = pallas_linear(flat(xr2), p["ffn_wr"], act="sigmoid")         # [BS, H]
    # fused: sigmoid(r) * (kk @ ffn_wv)
    ffn_out = pallas_linear(kk, p["ffn_wv"], gate=rr, gate_pos="out")
    x = x + ffn_out.reshape(B, S, H)

    new_state = (xa[:, -1, :], xf[:, -1, :])
    return x, new_state


def transformer_block(x, p, n_head, eps=1e-5):
    # GPT2Block semantics (ln_1 -> attn -> residual ; ln_2 -> MLP(gelu_new) -> residual)
    # Dropout layers behave as identity (deterministic forward). The model's additive
    # triu(-1e4) mask is softmax-equivalent to pure causal masking (done in-kernel).
    B, S, H = x.shape
    hd = H // n_head
    h = pallas_layernorm(x, p["ln1_g"], p["ln1_b"], eps=eps)
    qkv = pallas_linear(h.reshape(B * S, H), p["attn_w"], p["attn_b"])
    q, k, v = jnp.split(qkv, 3, axis=-1)

    def heads(t):
        return jnp.transpose(t.reshape(B, S, n_head, hd), (0, 2, 1, 3)).reshape(B * n_head, S, hd)

    attn = pallas_attention(heads(q), heads(k), heads(v), scale=1.0 / math.sqrt(hd))
    attn = jnp.transpose(attn.reshape(B, n_head, S, hd), (0, 2, 1, 3)).reshape(B * S, H)
    a = pallas_linear(attn, p["proj_w"], p["proj_b"]).reshape(B, S, H)
    x = x + a

    h = pallas_layernorm(x, p["ln2_g"], p["ln2_b"], eps=eps)
    m = pallas_linear(h.reshape(B * S, H), p["fc_w"], p["fc_b"], act="gelu_new")
    m = pallas_linear(m, p["mlp_proj_w"], p["mlp_proj_b"]).reshape(B, S, H)
    return x + m


def layer_router(x, params, num_layers, adaptation_factor=0.1):
    pooled = jnp.nan_to_num(x, nan=0.0, posinf=1.0, neginf=-1.0).mean(axis=1)   # [B, H]
    h = pallas_linear(pooled, params["r_w1"], params["r_b1"], act="gelu",
                      out_dtype=jnp.float32)
    tf = pallas_linear(h, params["r_w2"], params["r_b2"], out_dtype=jnp.float32)
    tf = tf.mean(axis=0).reshape(num_layers, 2)
    adaptive = params["layer_coefficients"] + adaptation_factor * tf
    coeff = jax.nn.softmax(adaptive, axis=-1)
    importance = coeff.sum(axis=-1)
    sparsity = 1.0 / (1.0 + math.exp(-0.5))          # sigmoid(sparsity_controller = 0.5)
    k = max(max(1, int(0.25 * num_layers)), int((1.0 - sparsity) * num_layers))
    _, idx = jax.lax.top_k(importance, k)
    active = jnp.zeros((num_layers,), dtype=bool).at[idx].set(True)
    active = active.at[0].set(True).at[num_layers - 1].set(True)
    return coeff, active


def hybrid_forward(params, input_ids, cfg):
    B, S = input_ids.shape
    H = cfg["hidden_size"]
    L = cfg["num_layers"]
    nH = cfg["num_heads"]

    x_f32 = params["emb"][input_ids] + params["pos_emb"][:S][None, :, :]   # [B, S, H]
    coeff, active = layer_router(x_f32, params, L)
    x = x_f32.astype(jnp.bfloat16)

    # reset_state(batch_size): zero recurrent states per layer (stateless forward)
    zero_state = (jnp.zeros((B, H), jnp.bfloat16), jnp.zeros((B, H), jnp.bfloat16))

    for i in range(L):
        rc = coeff[i, 0]
        tc = coeff[i, 1]
        rp = params["rwkv"][i]
        tp = params["tr"][i]

        def skip(xx):
            return xx

        def only_r(xx, rp=rp):
            return rwkv_block(xx, zero_state, rp)[0]

        def only_t(xx, tp=tp):
            return transformer_block(xx, tp, nH)

        def both(xx, rp=rp, tp=tp, rc=rc, tc=tc):
            r_out = rwkv_block(xx, zero_state, rp)[0]
            t_out = transformer_block(xx, tp, nH)
            return (rc * r_out.astype(jnp.float32)
                    + tc * t_out.astype(jnp.float32)).astype(xx.dtype)

        idx = (rc > 0.01).astype(jnp.int32) + 2 * (tc > 0.01).astype(jnp.int32)

        def run_layer(xx, idx=idx, branches=(skip, only_r, only_t, both)):
            return jax.lax.switch(idx, list(branches), xx)

        # inactive layers and single-path layers skip the unused branch at runtime
        x = jax.lax.cond(active[i], run_layer, skip, x)

    x = pallas_layernorm(x, params["ln_out_g"], params["ln_out_b"])
    logits = pallas_linear(x.reshape(B * S, H), params["head_w"],
                           out_dtype=jnp.float32)
    return logits.reshape(B, S, -1)


# ---------------------------------------------------------------------------
# Deterministic parameter initialization
# ---------------------------------------------------------------------------

def init_params(key, cfg):
    H = cfg["hidden_size"]
    L = cfg["num_layers"]
    V = cfg["vocab_size"]
    T = cfg["max_seq_len"]
    Hf = 4 * H
    keys = iter(jax.random.split(key, 256))

    def nrm(shape, std=0.02):
        return (std * jax.random.normal(next(keys), shape)).astype(jnp.float32)

    def wnrm(shape, std=0.02):          # matmul weights stored bf16 (MXU-native)
        return nrm(shape, std).astype(jnp.bfloat16)

    params = {}
    params["emb"] = nrm((V, H))

    # sinusoidal positional embedding (matches _initialize_weights)
    pos = jnp.arange(T, dtype=jnp.float32)[:, None]
    div = jnp.exp(jnp.arange(0, H, 2, dtype=jnp.float32) * (-(math.log(10000.0) / H)))
    pe = jnp.zeros((T, H), jnp.float32)
    pe = pe.at[:, 0::2].set(jnp.sin(pos * div))
    pe = pe.at[:, 1::2].set(jnp.cos(pos * div))
    params["pos_emb"] = pe

    # router
    params["r_w1"] = wnrm((H, H // 2))
    params["r_b1"] = jnp.zeros((H // 2,), jnp.float32)
    params["r_w2"] = wnrm((H // 2, L * 2))
    params["r_b2"] = jnp.zeros((L * 2,), jnp.float32)
    params["layer_coefficients"] = jnp.tile(jnp.array([[0.6, 0.4]], jnp.float32), (L, 1))

    tr = []
    for _ in range(L):
        tr.append(dict(
            ln1_g=jnp.ones((H,), jnp.float32), ln1_b=jnp.zeros((H,), jnp.float32),
            attn_w=wnrm((H, 3 * H)), attn_b=jnp.zeros((3 * H,), jnp.float32),
            proj_w=wnrm((H, H)), proj_b=jnp.zeros((H,), jnp.float32),
            ln2_g=jnp.ones((H,), jnp.float32), ln2_b=jnp.zeros((H,), jnp.float32),
            fc_w=wnrm((H, Hf)), fc_b=jnp.zeros((Hf,), jnp.float32),
            mlp_proj_w=wnrm((Hf, H)), mlp_proj_b=jnp.zeros((H,), jnp.float32),
        ))
    params["tr"] = tr

    ratio = jnp.arange(H, dtype=jnp.float32) / H
    rw = []
    for _ in range(L):
        rw.append(dict(
            ln1_g=jnp.ones((H,), jnp.float32), ln1_b=jnp.zeros((H,), jnp.float32),
            ln2_g=jnp.ones((H,), jnp.float32), ln2_b=jnp.zeros((H,), jnp.float32),
            att_mix_k=ratio, att_mix_v=ratio * 0.5 + 0.25, att_mix_r=ratio * 0.5,
            time_decay=jnp.linspace(-5.0, 1.0, H, dtype=jnp.float32),
            time_first=jnp.linspace(-1.0, 1.0, H, dtype=jnp.float32) * 0.5,
            att_wk=wnrm((H, H)), att_wv=wnrm((H, H)), att_wr=wnrm((H, H)), att_wo=wnrm((H, H)),
            ffn_mix_k=ratio, ffn_mix_r=ratio * 0.5,
            ffn_wk=wnrm((H, Hf)), ffn_wv=wnrm((Hf, H)), ffn_wr=wnrm((H, H)),
        ))
    params["rwkv"] = rw

    params["ln_out_g"] = jnp.ones((H,), jnp.float32)
    params["ln_out_b"] = jnp.zeros((H,), jnp.float32)
    params["head_w"] = wnrm((H, V))      # head: Linear(H, V, bias=False), stored transposed
    return params


# ---------------------------------------------------------------------------
# Main
# ---------------------------------------------------------------------------

if __name__ == "__main__":
    cfg = dict(hidden_size=32, num_layers=4, vocab_size=64, max_seq_len=16, num_heads=4)
    key = jax.random.PRNGKey(0)
    pkey, dkey = jax.random.split(key)
    params = init_params(pkey, cfg)

    B, S = 2, 8
    input_ids = jax.random.randint(dkey, (B, S), 0, cfg["vocab_size"], dtype=jnp.int32)

    logits = hybrid_forward(params, input_ids, cfg)
    logits = jax.block_until_ready(logits)

    assert logits.shape == (B, S, cfg["vocab_size"]), logits.shape
    assert bool(jnp.all(jnp.isfinite(logits)))
    print("KERNEL_OK")
</pallas_src>

<mosaic_0001>
module attributes {stable_mosaic.version = 11 : i64} {
  func.func @_linear_kernel(%arg0: i32, %arg1: i32, %arg2: i32, %arg3: memref<8x32xbf16, #tpu.memory_space<vmem>>, %arg4: memref<32x16xbf16, #tpu.memory_space<vmem>>, %arg5: memref<1x16xf32, #tpu.memory_space<vmem>>, %arg6: memref<8x16xf32, #tpu.memory_space<vmem>>, %arg7: memref<8x16xf32, #tpu.memory_space<vmem>>) attributes {dimension_semantics = [#tpu.dimension_semantics<parallel>, #tpu.dimension_semantics<parallel>, #tpu.dimension_semantics<arbitrary>], iteration_bounds = array<i64: 1, 1, 1>, scalar_prefetch = 0 : i64, scratch_operands = 1 : i64, tpu.core_type = #tpu.core_type<tc>, window_params = [{transform_indices = @transform_0, window_bounds = array<i64: 8, 32>}, {transform_indices = @transform_1, window_bounds = array<i64: 32, 16>}, {transform_indices = @transform_2, window_bounds = array<i64: 1, 16>}, {transform_indices = @transform_3, window_bounds = array<i64: 8, 16>}]} {
    %c0_i32 = arith.constant 0 : i32
    %0 = arith.cmpi eq, %arg2, %c0_i32 : i32
    %1 = arith.extui %0 : i1 to i32
    %c0_i32_0 = arith.constant 0 : i32
    %2 = arith.cmpi ne, %1, %c0_i32_0 : i32
    scf.if %2 {
      %cst_10 = arith.constant 0.000000e+00 : f32
      %12 = vector.broadcast %cst_10 : f32 to vector<8x16xf32>
      %c0_11 = arith.constant 0 : index
      %c0_12 = arith.constant 0 : index
      %13 = vector.load %arg7[%c0_11, %c0_12] : memref<8x16xf32, #tpu.memory_space<vmem>>, vector<8x16xf32>
      tpu.vector_store %arg7[%c0_11, %c0_12], %12 {strides = array<i32>} : memref<8x16xf32, #tpu.memory_space<vmem>>, vector<8x16xf32>,
    } else {
    }
    %c0 = arith.constant 0 : index
    %c0_1 = arith.constant 0 : index
    %3 = vector.load %arg3[%c0, %c0_1] : memref<8x32xbf16, #tpu.memory_space<vmem>>, vector<8x32xbf16>
    %c0_2 = arith.constant 0 : index
    %c0_3 = arith.constant 0 : index
    %4 = vector.load %arg7[%c0_2, %c0_3] : memref<8x16xf32, #tpu.memory_space<vmem>>, vector<8x16xf32>
    %c0_4 = arith.constant 0 : index
    %c0_5 = arith.constant 0 : index
    %5 = vector.load %arg4[%c0_4, %c0_5] : memref<32x16xbf16, #tpu.memory_space<vmem>>, vector<32x16xbf16>
    %cst = arith.constant dense<0.000000e+00> : vector<8x16xf32>
    %6 = tpu.matmul %3, %5, %cst {dimension_numbers = #tpu.dot_dimension_numbers<[1], [0], [0], [1], [0, 0, 1, 1], [], []>} : vector<8x32xbf16>, vector<32x16xbf16>, vector<8x16xf32> -> vector<8x16xf32>
    %7 = arith.addf %4, %6 : vector<8x16xf32>
    %c0_6 = arith.constant 0 : index
    %c0_7 = arith.constant 0 : index
    %8 = vector.load %arg7[%c0_6, %c0_7] : memref<8x16xf32, #tpu.memory_space<vmem>>, vector<8x16xf32>
    tpu.vector_store %arg7[%c0_6, %c0_7], %7 {strides = array<i32>} : memref<8x16xf32, #tpu.memory_space<vmem>>, vector<8x16xf32>,
    %c0_i32_8 = arith.constant 0 : i32
    %9 = arith.cmpi eq, %arg2, %c0_i32_8 : i32
    %10 = arith.extui %9 : i1 to i32
    %c0_i32_9 = arith.constant 0 : i32
    %11 = arith.cmpi ne, %10, %c0_i32_9 : i32
    scf.if %11 {
      %c0_10 = arith.constant 0 : index
      %c0_11 = arith.constant 0 : index
      %12 = vector.load %arg7[%c0_10, %c0_11] : memref<8x16xf32, #tpu.memory_space<vmem>>, vector<8x16xf32>
      %c0_12 = arith.constant 0 : index
      %c0_13 = arith.constant 0 : index
      %13 = vector.load %arg5[%c0_12, %c0_13] : memref<1x16xf32, #tpu.memory_space<vmem>>, vector<1x16xf32>
      %14 = vector.broadcast %13 : vector<1x16xf32> to vector<8x16xf32>
      %15 = arith.addf %12, %14 : vector<8x16xf32>
      %cst_14 = arith.constant 5.000000e-01 : f32
      %16 = vector.broadcast %cst_14 : f32 to vector<8x16xf32>
      %17 = arith.mulf %16, %15 : vector<8x16xf32>
      %cst_15 = arith.constant 0.707106769 : f32
      %18 = vector.broadcast %cst_15 : f32 to vector<8x16xf32>
      %19 = arith.mulf %15, %18 : vector<8x16xf32>
      %20 = math.erf %19 : vector<8x16xf32>
      %cst_16 = arith.constant 1.000000e+00 : f32
      %21 = vector.broadcast %cst_16 : f32 to vector<8x16xf32>
      %22 = arith.addf %21, %20 : vector<8x16xf32>
      %23 = arith.mulf %17, %22 : vector<8x16xf32>
      %c0_17 = arith.constant 0 : index
      %c0_18 = arith.constant 0 : index
      %24 = vector.load %arg6[%c0_17, %c0_18] : memref<8x16xf32, #tpu.memory_space<vmem>>, vector<8x16xf32>
      tpu.vector_store %arg6[%c0_17, %c0_18], %23 {strides = array<i32>} : memref<8x16xf32, #tpu.memory_space<vmem>>, vector<8x16xf32>,
    } else {
    }
    return
  }
  func.func @transform_0(%arg0: i32, %arg1: i32, %arg2: i32) -> (i32, i32) {
    %c0_i32 = arith.constant 0 : i32
    return %arg0, %arg2 : i32, i32
  }
  func.func @transform_1(%arg0: i32, %arg1: i32, %arg2: i32) -> (i32, i32) {
    %c0_i32 = arith.constant 0 : i32
    return %arg2, %arg1 : i32, i32
  }
  func.func @transform_2(%arg0: i32, %arg1: i32, %arg2: i32) -> (i32, i32) {
    %c0_i32 = arith.constant 0 : i32
    %c0_i32_0 = arith.constant 0 : i32
    return %c0_i32, %arg1 : i32, i32
  }
  func.func @transform_3(%arg0: i32, %arg1: i32, %arg2: i32) -> (i32, i32) {
    %c0_i32 = arith.constant 0 : i32
    return %arg0, %arg1 : i32, i32
  }
}

</mosaic_0001>

<bundles_post_ra>
// kernel: tpu_custom_call.1
= control target key start
LH: loop header
LB: loop body
LE: loop exit
PB: predicated region body
PF: predicated region fallthrough
CT: control target
= control target key end

     0   :  { %v163_v1 = vmov 0.0   ;;  %vm164_vm0 = vmmov 0   ;;  %vm20_vm1 = vcmask 130048   ;;  %s204_s0 = inlined_call_operand.vmem [shape: bf16[8,32], index: 0, kind: input, shape index: {}]   ;;  %s205_s1 = inlined_call_operand.vmem [shape: bf16[32,16], index: 1, kind: input, shape index: {}]   ;;  %s206_s2 = inlined_call_operand.vmem [shape: f32[1,16], index: 2, kind: input, shape index: {}]   ;;  %s207_s3 = inlined_call_operand.hbm [shape: f32[8,16], index: 3, kind: output, shape index: {}]  }
   0x1   :  { %v137_v0 = vld [vmem:[%s205_s1 + $0x8] sm:$0xff]   ;;  %126 = vmatprep.subr.bf16.mxu0 %v163_v1  ;;  %v138_v2 = vld [vmem:[%s205_s1] sm:$0xff]   ;;  %130 = vmatprep.mubr.msk.bf16.mxu0 %vm164_vm0, %v163_v1 }
   0x2   :  { %127 = vmatpush3.bf16.msra.mxu0 %v137_v0 }
   0x3   :  { %8 = vsyncpa [#allocation4], 0  ;;  %128 = vmatprep.subr.bf16.mxu0 %v163_v1  ;;  %21 = vst.msk [vmem:[#allocation2] sm:$0xff] %vm20_vm1, %v163_v1  ;;  %v22_v3 = vld [vmem:[%s204_s0] sm:$0xf]  ;;  %vm40_vm2 = vcmask 261120  }
   0x4   :  { %v122_v10 = vld [vmem:[%s206_s2] ss:$0 sm:$0xff]  ;;  %s165_s0 = smov [#allocation3]  }
   0x5   :  { %s111_s19 = sshll.u32 %s165_s0, 4  ;;  %s112_s19 = int_to_ptr.vmem [resolvable:$true] %s111_s19 }
   0x6   :  { %129 = vmatpush3.bf16.msra.mxu0 %v138_v2  ;;  %s141_s20 = scalar_lea.vmem %s112_s19, 128  ;;  %p146_p1 = scmp.lt.s32.totalorder %s112_s19, %s112_s19 }
   0x7   :  { %p142_p0 = scmp.ne.s32.totalorder %s112_s19, %s141_s20  ;;  %p147_p2 = scmp.lt.s32.totalorder %s141_s20, %s141_s20 }
   0x9   :  { %131 = vmatmul.mubr.msk.bf16.vlgmr.msra.gmra.mxu0 %vm40_vm2, %v22_v3  ;;  %p148_p3 = por %p147_p2, %p146_p1 }
   0xa   :  { %v23_v4 = vld [vmem:[#allocation2] sm:$0xff] }
   0xb   :  { %p149_p4 = pnand %p148_p3, %p142_p0 }
  0xc9   :  { %v78_v5 = vpop.f32.mrf.mxu0 }
  0xca   :  { %v84_v6 = vadd.f32 %v78_v5, %v23_v4 }
  0xcb   :  { %v132_v7 = vpop.f32.mrf.mxu0 }
  0xcc   :  { %86 = vst.msk [vmem:[#allocation2] sm:$0xff] %vm20_vm1, %v84_v6 }
  0xcd   :  { %v81_v8 = vpop.f32.mrf.mxu0 }
  0xcf   :  { %v133_v9 = vpop.f32.mrf.mxu0 }
  0xd3   :  { %v90_v11 = vld [vmem:[#allocation2] sm:$0xff] }
  0xd4   :  { %v98_v12 = vadd.f32 %v122_v10, %v90_v11 }
  0xd6   :  { %v100_v13 = vmul.f32 0.70710677, %v98_v12  ;;  %v99_v15 = vmul.f32 0.5, %v98_v12 }
  0xd8   :  { %139 = verf.f32 %v100_v13 }
  0xe5   :  { %v140_v14 = vpop.eup %139 }
  0xe6   :  { %v102_v16 = vadd.f32 1.0, %v140_v14 }
  0xe8   :  { %v103_v17 = vmul.f32 %v102_v16, %v99_v15 }
  0xea   :  { %104 = vst.msk [vmem:[#allocation3] sm:$0xff] %vm20_vm1, %v103_v17 }
  0xeb   :  { %152 = shalt.err (!%p149_p4)
}
  0xec   :  { %114 = dma.vmem_to_hbm [thread:$0]  %s112_s19, 128, %s207_s3, [#allocation4]  }
  0xed   :  { %161 = dma.done.wait [#allocation4], 128  }
  0xee   :  { %162 = vsyncadd [#allocation4], 4294967168 }
  0xef   :  { %118 = vsyncpa [#allocation4], 1 }

</bundles_post_ra>
